<compile_context>
chip_gen: v7x
topology: tpu7x:2x2x1
jax: 0.10.0
libtpu: 0.0.40
codegen_flags: <defaults>
</compile_context>

<pallas_src>
import jax
import jax.numpy as jnp
from jax.experimental import pallas as pl
from jax.experimental.pallas import tpu as pltpu  # noqa: F401  (kept for TPU backend)

BN_EPS = 1e-5


def fused_model1_kernel(
    xb_ref, xs_ref,          # [B, n_in] each
    w1e_ref,                 # [2*n_in, h0]   K-stacked  [w1_bulk; w1_sc]
    p1e_ref,                 # [2, 3, h0]     per-stream (bias, gamma, beta)
    w2e_ref,                 # [2*h0, h1]     K-stacked  [w2_bulk; w2_sc]
    b2e_ref,                 # [2, 1, h1]     per-stream bias
    w1d_ref,                 # [h1, h0]
    p1d_ref,                 # [3, h0]        (bias, gamma, beta)
    w2d_ref,                 # [h0, n_in]
    b2d_ref,                 # [1, n_in]
    zb_ref, zs_ref, xbb_ref, xsb_ref,
):
    B, n_in = xb_ref.shape
    h0 = w1e_ref.shape[1]
    h1 = w2e_ref.shape[1]
    inv_b = 1.0 / B

    def batchnorm(h, gamma, beta):
        # Training-mode BN (batch stats, biased variance), single pass over (2,B,H).
        mean = jnp.sum(h, axis=1, keepdims=True) * inv_b
        msq = jnp.sum(h * h, axis=1, keepdims=True) * inv_b
        var = jnp.maximum(msq - mean * mean, 0.0)          # guard cancellation
        return (h - mean) * jax.lax.rsqrt(var + BN_EPS) * gamma + beta

    # ---- encoders: block-diagonal matmuls (one MXU push per layer for both streams) --
    zx = jnp.zeros((B, n_in), jnp.float32)
    lhs1 = jnp.concatenate(
        [jnp.concatenate([xb_ref[...], zx], axis=1),
         jnp.concatenate([zx, xs_ref[...]], axis=1)], axis=0)          # [2B, 2*n_in]
    p1e = p1e_ref[...]                                                 # [2, 3, h0]
    h = jnp.dot(lhs1, w1e_ref[...], preferred_element_type=jnp.float32)
    h = h.reshape(2, B, h0) + p1e[:, 0:1, :]
    h = jnp.maximum(h, 0.0)
    # TODO(synk): Dropout(p=0.1) treated as identity (eval behavior); BatchNorm uses
    # batch statistics (train behavior), same as the previously accepted kernel.
    hn = batchnorm(h, p1e[:, 1:2, :], p1e[:, 2:3, :])                  # [2, B, h0]

    zh = jnp.zeros((B, h0), jnp.float32)
    lhs2 = jnp.concatenate(
        [jnp.concatenate([hn[0], zh], axis=1),
         jnp.concatenate([zh, hn[1]], axis=1)], axis=0)                # [2B, 2*h0]
    z = jnp.dot(lhs2, w2e_ref[...], preferred_element_type=jnp.float32)
    z = z.reshape(2, B, h1) + b2e_ref[...]                             # [2, B, h1]
    zb_ref[...] = z[0]
    zs_ref[...] = z[1]

    # ---- shared decoder: both streams batched for the matmuls, per-stream BN stats ---
    p1d = p1d_ref[...]                                                 # [3, h0]
    hd = jnp.dot(z.reshape(2 * B, h1), w1d_ref[...],
                 preferred_element_type=jnp.float32) + p1d[0:1, :]
    hd = jnp.maximum(hd, 0.0).reshape(2, B, h0)
    hnd = batchnorm(hd, p1d[1:2, :], p1d[2:3, :])                      # [2, B, h0]
    xbar = jnp.dot(hnd.reshape(2 * B, h0), w2d_ref[...],
                   preferred_element_type=jnp.float32) + b2d_ref[...]  # [2B, n_in]
    xbb_ref[...] = xbar[0:B, :]
    xsb_ref[...] = xbar[B:2 * B, :]


def _full_spec(shape):
    # Whole-array block (satisfies the (8,128) rule by equalling the full array dims).
    return pl.BlockSpec(shape, lambda: (0,) * len(shape))


def make_block_params(key, n_in, h0, h_out):
    """Deterministic init for Linear(n_in,h0) + BN(h0) + Linear(h0,h_out)."""
    k1, k2, k3, k4 = jax.random.split(key, 4)
    s1 = 1.0 / jnp.sqrt(n_in)
    s2 = 1.0 / jnp.sqrt(h0)
    w1 = jax.random.uniform(k1, (n_in, h0), jnp.float32, -s1, s1)
    b1 = jax.random.uniform(k2, (1, h0), jnp.float32, -s1, s1)
    gamma = jnp.ones((1, h0), jnp.float32)
    beta = jnp.zeros((1, h0), jnp.float32)
    w2 = jax.random.uniform(k3, (h0, h_out), jnp.float32, -s2, s2)
    b2 = jax.random.uniform(k4, (1, h_out), jnp.float32, -s2, s2)
    return (w1, b1, gamma, beta, w2, b2)


def pack_params(bulk_enc, sc_enc, dec):
    """Pack/stack parameters ONCE outside the hot path: 10 kernel inputs instead of 20,
    encoder weights K-stacked for the in-kernel block-diagonal matmuls."""
    w1b, b1b, gb, bb, w2b, b2b = bulk_enc
    w1s, b1s, gs, bs, w2s, b2s = sc_enc
    w1d, b1d, gd, bd, w2d, b2d = dec
    w1e = jnp.concatenate([w1b, w1s], axis=0)                      # [2*n_in, h0]
    p1e = jnp.stack([jnp.concatenate([b1b, gb, bb], axis=0),
                     jnp.concatenate([b1s, gs, bs], axis=0)])      # [2, 3, h0]
    w2e = jnp.concatenate([w2b, w2s], axis=0)                      # [2*h0, h1]
    b2e = jnp.stack([b2b, b2s])                                    # [2, 1, h1]
    p1d = jnp.concatenate([b1d, gd, bd], axis=0)                   # [3, h0]
    return (w1e, p1e, w2e, b2e, w1d, p1d, w2d, b2d)


def model1_forward(x_bulk, x_sc, packed):
    w1e, p1e, w2e, b2e, w1d, p1d, w2d, b2d = packed
    B, n_in = x_bulk.shape
    h1 = w2e.shape[1]
    args = (x_bulk, x_sc, w1e, p1e, w2e, b2e, w1d, p1d, w2d, b2d)
    out_shape = (jax.ShapeDtypeStruct((B, h1), jnp.float32),
                 jax.ShapeDtypeStruct((B, h1), jnp.float32),
                 jax.ShapeDtypeStruct((B, n_in), jnp.float32),
                 jax.ShapeDtypeStruct((B, n_in), jnp.float32))
    return pl.pallas_call(
        fused_model1_kernel,
        out_shape=out_shape,
        in_specs=[_full_spec(a.shape) for a in args],
        out_specs=tuple(_full_spec(s.shape) for s in out_shape),
    )(*args)


def reference_forward(x_bulk, x_sc, bulk_enc, sc_enc, dec):
    """Plain-JAX reference with identical semantics (BN batch stats, dropout=identity)."""
    def block(x, params):
        w1, b1, gamma, beta, w2, b2 = params
        h = jnp.maximum(x @ w1 + b1, 0.0)
        mean = jnp.mean(h, axis=0, keepdims=True)
        var = jnp.mean((h - mean) ** 2, axis=0, keepdims=True)
        h = (h - mean) / jnp.sqrt(var + BN_EPS) * gamma + beta
        return h @ w2 + b2
    z_bulk = block(x_bulk, bulk_enc)
    z_sc = block(x_sc, sc_enc)
    return z_bulk, z_sc, block(z_bulk, dec), block(z_sc, dec)


if __name__ == "__main__":
    # Small shapes consistent with the module: model1(n_input=32, n_hidden=[64, 16]).
    B = 8
    n_input = 32
    n_hidden = (64, 16)

    key = jax.random.PRNGKey(0)
    k_bulk, k_sc, k_dec, k_xb, k_xs = jax.random.split(key, 5)

    bulk_enc = make_block_params(k_bulk, n_input, n_hidden[0], n_hidden[1])
    sc_enc = make_block_params(k_sc, n_input, n_hidden[0], n_hidden[1])
    dec = make_block_params(k_dec, n_hidden[1], n_hidden[0], n_input)

    x_bulk = jax.random.normal(k_xb, (B, n_input), jnp.float32)
    x_sc = jax.random.normal(k_xs, (B, n_input), jnp.float32)

    packed = pack_params(bulk_enc, sc_enc, dec)      # once, outside the hot path

    fwd = jax.jit(model1_forward)
    z_bulk, z_sc, x_bulk_bar, x_sc_bar = fwd(x_bulk, x_sc, packed)
    jax.block_until_ready((z_bulk, z_sc, x_bulk_bar, x_sc_bar))

    assert z_bulk.shape == (B, n_hidden[1])
    assert z_sc.shape == (B, n_hidden[1])
    assert x_bulk_bar.shape == (B, n_input)
    assert x_sc_bar.shape == (B, n_input)

    ref = reference_forward(x_bulk, x_sc, bulk_enc, sc_enc, dec)
    for got, want in zip((z_bulk, z_sc, x_bulk_bar, x_sc_bar), ref):
        err = float(jnp.max(jnp.abs(got - want)))
        assert jnp.allclose(got, want, rtol=1e-3, atol=1e-3), err

    print("KERNEL_OK")
</pallas_src>

<mosaic_0001>
module attributes {stable_mosaic.version = 11 : i64} {
  func.func @fused_model1_kernel(%arg0: memref<8x32xf32, #tpu.memory_space<vmem>>, %arg1: memref<8x32xf32, #tpu.memory_space<vmem>>, %arg2: memref<64x64xf32, #tpu.memory_space<vmem>>, %arg3: memref<2x3x64xf32, #tpu.memory_space<vmem>>, %arg4: memref<128x16xf32, #tpu.memory_space<vmem>>, %arg5: memref<2x1x16xf32, #tpu.memory_space<vmem>>, %arg6: memref<16x64xf32, #tpu.memory_space<vmem>>, %arg7: memref<3x64xf32, #tpu.memory_space<vmem>>, %arg8: memref<64x32xf32, #tpu.memory_space<vmem>>, %arg9: memref<1x32xf32, #tpu.memory_space<vmem>>, %arg10: memref<8x16xf32, #tpu.memory_space<vmem>>, %arg11: memref<8x16xf32, #tpu.memory_space<vmem>>, %arg12: memref<8x32xf32, #tpu.memory_space<vmem>>, %arg13: memref<8x32xf32, #tpu.memory_space<vmem>>) attributes {dimension_semantics = [], scalar_prefetch = 0 : i64, scratch_operands = 0 : i64, tpu.core_type = #tpu.core_type<tc>} {
    %cst = arith.constant 0.000000e+00 : f32
    %0 = vector.broadcast %cst : f32 to vector<8x32xf32>
    %c0 = arith.constant 0 : index
    %c0_0 = arith.constant 0 : index
    %1 = vector.load %arg0[%c0, %c0_0] : memref<8x32xf32, #tpu.memory_space<vmem>>, vector<8x32xf32>
    %2 = tpu.concatenate %1, %0 in 1 : vector<8x32xf32>, vector<8x32xf32> -> vector<8x64xf32>
    %c0_1 = arith.constant 0 : index
    %c0_2 = arith.constant 0 : index
    %3 = vector.load %arg1[%c0_1, %c0_2] : memref<8x32xf32, #tpu.memory_space<vmem>>, vector<8x32xf32>
    %4 = tpu.concatenate %0, %3 in 1 : vector<8x32xf32>, vector<8x32xf32> -> vector<8x64xf32>
    %5 = tpu.concatenate %2, %4 in 0 : vector<8x64xf32>, vector<8x64xf32> -> vector<16x64xf32>
    %c0_3 = arith.constant 0 : index
    %c0_4 = arith.constant 0 : index
    %c0_5 = arith.constant 0 : index
    %6 = vector.load %arg3[%c0_3, %c0_4, %c0_5] : memref<2x3x64xf32, #tpu.memory_space<vmem>>, vector<2x3x64xf32>
    %c0_6 = arith.constant 0 : index
    %c0_7 = arith.constant 0 : index
    %7 = vector.load %arg2[%c0_6, %c0_7] : memref<64x64xf32, #tpu.memory_space<vmem>>, vector<64x64xf32>
    %cst_8 = arith.constant dense<0.000000e+00> : vector<16x64xf32>
    %8 = tpu.matmul %5, %7, %cst_8 {dimension_numbers = #tpu.dot_dimension_numbers<[1], [0], [0], [1], [0, 0, 1, 1], [], []>} : vector<16x64xf32>, vector<64x64xf32>, vector<16x64xf32> -> vector<16x64xf32>
    %9 = vector.shape_cast %8 : vector<16x64xf32> to vector<2x8x64xf32>
    %10 = vector.extract_strided_slice %6 {offsets = [0, 0, 0], sizes = [2, 1, 64], strides = [1, 1, 1]} : vector<2x3x64xf32> to vector<2x1x64xf32>
    %11 = vector.broadcast %10 : vector<2x1x64xf32> to vector<2x8x64xf32>
    %12 = arith.addf %9, %11 : vector<2x8x64xf32>
    %cst_9 = arith.constant 0.000000e+00 : f32
    %13 = vector.broadcast %cst_9 : f32 to vector<2x8x64xf32>
    %14 = arith.maximumf %12, %13 : vector<2x8x64xf32>
    %15 = vector.extract_strided_slice %6 {offsets = [0, 1, 0], sizes = [2, 1, 64], strides = [1, 1, 1]} : vector<2x3x64xf32> to vector<2x1x64xf32>
    %16 = vector.extract_strided_slice %6 {offsets = [0, 2, 0], sizes = [2, 1, 64], strides = [1, 1, 1]} : vector<2x3x64xf32> to vector<2x1x64xf32>
    %cst_10 = arith.constant dense<0.000000e+00> : vector<2x64xf32>
    %17 = vector.multi_reduction <add>, %14, %cst_10 [1] : vector<2x8x64xf32> to vector<2x64xf32>
    %18 = vector.shape_cast %17 : vector<2x64xf32> to vector<2x1x64xf32>
    %cst_11 = arith.constant 1.250000e-01 : f32
    %19 = vector.broadcast %cst_11 : f32 to vector<2x1x64xf32>
    %20 = arith.mulf %18, %19 : vector<2x1x64xf32>
    %21 = arith.mulf %14, %14 : vector<2x8x64xf32>
    %cst_12 = arith.constant dense<0.000000e+00> : vector<2x64xf32>
    %22 = vector.multi_reduction <add>, %21, %cst_12 [1] : vector<2x8x64xf32> to vector<2x64xf32>
    %23 = vector.shape_cast %22 : vector<2x64xf32> to vector<2x1x64xf32>
    %cst_13 = arith.constant 1.250000e-01 : f32
    %24 = vector.broadcast %cst_13 : f32 to vector<2x1x64xf32>
    %25 = arith.mulf %23, %24 : vector<2x1x64xf32>
    %26 = arith.mulf %20, %20 : vector<2x1x64xf32>
    %27 = arith.subf %25, %26 : vector<2x1x64xf32>
    %cst_14 = arith.constant 0.000000e+00 : f32
    %28 = vector.broadcast %cst_14 : f32 to vector<2x1x64xf32>
    %29 = arith.maximumf %27, %28 : vector<2x1x64xf32>
    %30 = vector.broadcast %20 : vector<2x1x64xf32> to vector<2x8x64xf32>
    %31 = arith.subf %14, %30 : vector<2x8x64xf32>
    %cst_15 = arith.constant 9.99999974E-6 : f32
    %32 = vector.broadcast %cst_15 : f32 to vector<2x1x64xf32>
    %33 = arith.addf %29, %32 : vector<2x1x64xf32>
    %34 = math.rsqrt %33 : vector<2x1x64xf32>
    %35 = vector.broadcast %34 : vector<2x1x64xf32> to vector<2x8x64xf32>
    %36 = arith.mulf %31, %35 : vector<2x8x64xf32>
    %37 = vector.broadcast %15 : vector<2x1x64xf32> to vector<2x8x64xf32>
    %38 = arith.mulf %36, %37 : vector<2x8x64xf32>
    %39 = vector.broadcast %16 : vector<2x1x64xf32> to vector<2x8x64xf32>
    %40 = arith.addf %38, %39 : vector<2x8x64xf32>
    %cst_16 = arith.constant 0.000000e+00 : f32
    %41 = vector.broadcast %cst_16 : f32 to vector<8x64xf32>
    %42 = vector.extract_strided_slice %40 {offsets = [0, 0, 0], sizes = [1, 8, 64], strides = [1, 1, 1]} : vector<2x8x64xf32> to vector<1x8x64xf32>
    %43 = vector.shape_cast %42 : vector<1x8x64xf32> to vector<8x64xf32>
    %44 = tpu.concatenate %43, %41 in 1 : vector<8x64xf32>, vector<8x64xf32> -> vector<8x128xf32>
    %45 = vector.extract_strided_slice %40 {offsets = [1, 0, 0], sizes = [1, 8, 64], strides = [1, 1, 1]} : vector<2x8x64xf32> to vector<1x8x64xf32>
    %46 = vector.shape_cast %45 : vector<1x8x64xf32> to vector<8x64xf32>
    %47 = tpu.concatenate %41, %46 in 1 : vector<8x64xf32>, vector<8x64xf32> -> vector<8x128xf32>
    %48 = tpu.concatenate %44, %47 in 0 : vector<8x128xf32>, vector<8x128xf32> -> vector<16x128xf32>
    %c0_17 = arith.constant 0 : index
    %c0_18 = arith.constant 0 : index
    %49 = vector.load %arg4[%c0_17, %c0_18] : memref<128x16xf32, #tpu.memory_space<vmem>>, vector<128x16xf32>
    %cst_19 = arith.constant dense<0.000000e+00> : vector<16x16xf32>
    %50 = tpu.matmul %48, %49, %cst_19 {dimension_numbers = #tpu.dot_dimension_numbers<[1], [0], [0], [1], [0, 0, 1, 1], [], []>} : vector<16x128xf32>, vector<128x16xf32>, vector<16x16xf32> -> vector<16x16xf32>
    %51 = vector.shape_cast %50 : vector<16x16xf32> to vector<2x8x16xf32>
    %c0_20 = arith.constant 0 : index
    %c0_21 = arith.constant 0 : index
    %c0_22 = arith.constant 0 : index
    %52 = vector.load %arg5[%c0_20, %c0_21, %c0_22] : memref<2x1x16xf32, #tpu.memory_space<vmem>>, vector<2x1x16xf32>
    %53 = vector.broadcast %52 : vector<2x1x16xf32> to vector<2x8x16xf32>
    %54 = arith.addf %51, %53 : vector<2x8x16xf32>
    %55 = vector.extract_strided_slice %54 {offsets = [0, 0, 0], sizes = [1, 8, 16], strides = [1, 1, 1]} : vector<2x8x16xf32> to vector<1x8x16xf32>
    %56 = vector.shape_cast %55 : vector<1x8x16xf32> to vector<8x16xf32>
    %c0_23 = arith.constant 0 : index
    %c0_24 = arith.constant 0 : index
    %57 = vector.load %arg10[%c0_23, %c0_24] : memref<8x16xf32, #tpu.memory_space<vmem>>, vector<8x16xf32>
    tpu.vector_store %arg10[%c0_23, %c0_24], %56 {strides = array<i32>} : memref<8x16xf32, #tpu.memory_space<vmem>>, vector<8x16xf32>,
    %58 = vector.extract_strided_slice %54 {offsets = [1, 0, 0], sizes = [1, 8, 16], strides = [1, 1, 1]} : vector<2x8x16xf32> to vector<1x8x16xf32>
    %59 = vector.shape_cast %58 : vector<1x8x16xf32> to vector<8x16xf32>
    %c0_25 = arith.constant 0 : index
    %c0_26 = arith.constant 0 : index
    %60 = vector.load %arg11[%c0_25, %c0_26] : memref<8x16xf32, #tpu.memory_space<vmem>>, vector<8x16xf32>
    tpu.vector_store %arg11[%c0_25, %c0_26], %59 {strides = array<i32>} : memref<8x16xf32, #tpu.memory_space<vmem>>, vector<8x16xf32>,
    %c0_27 = arith.constant 0 : index
    %c0_28 = arith.constant 0 : index
    %61 = vector.load %arg7[%c0_27, %c0_28] : memref<3x64xf32, #tpu.memory_space<vmem>>, vector<3x64xf32>
    %62 = vector.shape_cast %54 : vector<2x8x16xf32> to vector<16x16xf32>
    %c0_29 = arith.constant 0 : index
    %c0_30 = arith.constant 0 : index
    %63 = vector.load %arg6[%c0_29, %c0_30] : memref<16x64xf32, #tpu.memory_space<vmem>>, vector<16x64xf32>
    %cst_31 = arith.constant dense<0.000000e+00> : vector<16x64xf32>
    %64 = tpu.matmul %62, %63, %cst_31 {dimension_numbers = #tpu.dot_dimension_numbers<[1], [0], [0], [1], [0, 0, 1, 1], [], []>} : vector<16x16xf32>, vector<16x64xf32>, vector<16x64xf32> -> vector<16x64xf32>
    %65 = vector.extract_strided_slice %61 {offsets = [0, 0], sizes = [1, 64], strides = [1, 1]} : vector<3x64xf32> to vector<1x64xf32>
    %66 = vector.broadcast %65 : vector<1x64xf32> to vector<16x64xf32>
    %67 = arith.addf %64, %66 : vector<16x64xf32>
    %cst_32 = arith.constant 0.000000e+00 : f32
    %68 = vector.broadcast %cst_32 : f32 to vector<16x64xf32>
    %69 = arith.maximumf %67, %68 : vector<16x64xf32>
    %70 = vector.shape_cast %69 : vector<16x64xf32> to vector<2x8x64xf32>
    %71 = vector.extract_strided_slice %61 {offsets = [1, 0], sizes = [1, 64], strides = [1, 1]} : vector<3x64xf32> to vector<1x64xf32>
    %72 = vector.extract_strided_slice %61 {offsets = [2, 0], sizes = [1, 64], strides = [1, 1]} : vector<3x64xf32> to vector<1x64xf32>
    %cst_33 = arith.constant dense<0.000000e+00> : vector<2x64xf32>
    %73 = vector.multi_reduction <add>, %70, %cst_33 [1] : vector<2x8x64xf32> to vector<2x64xf32>
    %74 = vector.shape_cast %73 : vector<2x64xf32> to vector<2x1x64xf32>
    %cst_34 = arith.constant 1.250000e-01 : f32
    %75 = vector.broadcast %cst_34 : f32 to vector<2x1x64xf32>
    %76 = arith.mulf %74, %75 : vector<2x1x64xf32>
    %77 = arith.mulf %70, %70 : vector<2x8x64xf32>
    %cst_35 = arith.constant dense<0.000000e+00> : vector<2x64xf32>
    %78 = vector.multi_reduction <add>, %77, %cst_35 [1] : vector<2x8x64xf32> to vector<2x64xf32>
    %79 = vector.shape_cast %78 : vector<2x64xf32> to vector<2x1x64xf32>
    %cst_36 = arith.constant 1.250000e-01 : f32
    %80 = vector.broadcast %cst_36 : f32 to vector<2x1x64xf32>
    %81 = arith.mulf %79, %80 : vector<2x1x64xf32>
    %82 = arith.mulf %76, %76 : vector<2x1x64xf32>
    %83 = arith.subf %81, %82 : vector<2x1x64xf32>
    %cst_37 = arith.constant 0.000000e+00 : f32
    %84 = vector.broadcast %cst_37 : f32 to vector<2x1x64xf32>
    %85 = arith.maximumf %83, %84 : vector<2x1x64xf32>
    %86 = vector.broadcast %76 : vector<2x1x64xf32> to vector<2x8x64xf32>
    %87 = arith.subf %70, %86 : vector<2x8x64xf32>
    %cst_38 = arith.constant 9.99999974E-6 : f32
    %88 = vector.broadcast %cst_38 : f32 to vector<2x1x64xf32>
    %89 = arith.addf %85, %88 : vector<2x1x64xf32>
    %90 = math.rsqrt %89 : vector<2x1x64xf32>
    %91 = vector.broadcast %90 : vector<2x1x64xf32> to vector<2x8x64xf32>
    %92 = arith.mulf %87, %91 : vector<2x8x64xf32>
    %93 = vector.shape_cast %71 : vector<1x64xf32> to vector<1x1x64xf32>
    %94 = vector.broadcast %93 : vector<1x1x64xf32> to vector<2x8x64xf32>
    %95 = arith.mulf %92, %94 : vector<2x8x64xf32>
    %96 = vector.shape_cast %72 : vector<1x64xf32> to vector<1x1x64xf32>
    %97 = vector.broadcast %96 : vector<1x1x64xf32> to vector<2x8x64xf32>
    %98 = arith.addf %95, %97 : vector<2x8x64xf32>
    %99 = vector.shape_cast %98 : vector<2x8x64xf32> to vector<16x64xf32>
    %c0_39 = arith.constant 0 : index
    %c0_40 = arith.constant 0 : index
    %100 = vector.load %arg8[%c0_39, %c0_40] : memref<64x32xf32, #tpu.memory_space<vmem>>, vector<64x32xf32>
    %cst_41 = arith.constant dense<0.000000e+00> : vector<16x32xf32>
    %101 = tpu.matmul %99, %100, %cst_41 {dimension_numbers = #tpu.dot_dimension_numbers<[1], [0], [0], [1], [0, 0, 1, 1], [], []>} : vector<16x64xf32>, vector<64x32xf32>, vector<16x32xf32> -> vector<16x32xf32>
    %c0_42 = arith.constant 0 : index
    %c0_43 = arith.constant 0 : index
    %102 = vector.load %arg9[%c0_42, %c0_43] : memref<1x32xf32, #tpu.memory_space<vmem>>, vector<1x32xf32>
    %103 = vector.broadcast %102 : vector<1x32xf32> to vector<16x32xf32>
    %104 = arith.addf %101, %103 : vector<16x32xf32>
    %105 = vector.extract_strided_slice %104 {offsets = [0, 0], sizes = [8, 32], strides = [1, 1]} : vector<16x32xf32> to vector<8x32xf32>
    %c0_44 = arith.constant 0 : index
    %c0_45 = arith.constant 0 : index
    %106 = vector.load %arg12[%c0_44, %c0_45] : memref<8x32xf32, #tpu.memory_space<vmem>>, vector<8x32xf32>
    tpu.vector_store %arg12[%c0_44, %c0_45], %105 {strides = array<i32>} : memref<8x32xf32, #tpu.memory_space<vmem>>, vector<8x32xf32>,
    %107 = vector.extract_strided_slice %104 {offsets = [8, 0], sizes = [8, 32], strides = [1, 1]} : vector<16x32xf32> to vector<8x32xf32>
    %c0_46 = arith.constant 0 : index
    %c0_47 = arith.constant 0 : index
    %108 = vector.load %arg13[%c0_46, %c0_47] : memref<8x32xf32, #tpu.memory_space<vmem>>, vector<8x32xf32>
    tpu.vector_store %arg13[%c0_46, %c0_47], %107 {strides = array<i32>} : memref<8x32xf32, #tpu.memory_space<vmem>>, vector<8x32xf32>,
    return
  }
}

</mosaic_0001>

<bundles_post_ra>
// kernel: model1_forward.1
= control target key start
LH: loop header
LB: loop body
LE: loop exit
PB: predicated region body
PF: predicated region fallthrough
CT: control target
= control target key end

     0   :  { %19 = vsyncpa [#allocation3], 0  ;;  %s1245_s0 = inlined_call_operand.vmem [shape: f32[8,32], index: 0, kind: input, shape index: {}]   ;;  %s1246_s1 = inlined_call_operand.vmem [shape: f32[8,32], index: 1, kind: input, shape index: {}]   ;;  %s1247_s2 = inlined_call_operand.vmem [shape: f32[64,64], index: 2, kind: input, shape index: {}]   ;;  %s1248_s3 = inlined_call_operand.vmem [shape: f32[2,3,64], index: 3, kind: input, shape index: {}]   ;;  %s1249_s4 = inlined_call_operand.vmem [shape: f32[128,16], index: 4, kind: input, shape index: {}]   ;;  %s1250_s5 = inlined_call_operand.vmem [shape: f32[2,1,16], index: 5, kind: input, shape index: {}]   ;;  %s1251_s6 = inlined_call_operand.vmem [shape: f32[16,64], index: 6, kind: input, shape index: {}]   ;;  %s1252_s7 = inlined_call_operand.vmem [shape: f32[3,64], index: 7, kind: input, shape index: {}]   ;;  %s1253_s8 = inlined_call_operand.vmem [shape: f32[64,32], index: 8, kind: input, shape index: {}]   ;;  %s1254_s9 = inlined_call_operand.vmem [shape: f32[1,32], index: 9, kind: input, shape index: {}]   ;;  %s1255_s10 = inlined_call_operand.hbm [shape: f32[8,16], index: 10, kind: output, shape index: {0}]   ;;  %s1256_s11 = inlined_call_operand.hbm [shape: f32[8,16], index: 11, kind: output, shape index: {1}]   ;;  %s1257_s12 = inlined_call_operand.hbm [shape: f32[8,32], index: 12, kind: output, shape index: {2}]   ;;  %s1258_s13 = inlined_call_operand.hbm [shape: f32[8,32], index: 13, kind: output, shape index: {3}]  }
   0x1   :  { %20 = vsyncpa [#allocation5], 0  ;;  %v45_v0 = vld [vmem:[%s1246_s1] sm:$0xff]  ;;  %v54_v2 = vld [vmem:[%s1247_s2 + $0x8] sm:$0xff]  ;;  %s952_s14 = smov 32   ;;  %vm43_vm0 = vcmask 261120  }
   0x2   :  { %v53_v1 = vld [vmem:[%s1247_s2] sm:$0xff]  ;;  %47 = vrot.lane.b32.xlu0 %v45_v0, %s952_s14  ;;  %v55_v4 = vld [vmem:[%s1247_s2 + $0x10] sm:$0xff]  ;;  %v56_v5 = vld [vmem:[%s1247_s2 + $0x18] sm:$0xff]  ;;  %vm61_vm1 = vcmask 523264  }
   0x3   :  { %v776_v3 = vpack.c.bf16 %v54_v2, %v53_v1  ;;  %v780_v6 = vpack.c.bf16 %v56_v5, %v55_v4  ;;  %v57_v7 = vld [vmem:[%s1247_s2 + $0x20] sm:$0xff]  ;;  %v58_v8 = vld [vmem:[%s1247_s2 + $0x28] sm:$0xff] }
   0x4   :  { %v42_v9 = vld [vmem:[%s1245_s0] sm:$0xff] }
   0x5   :  { %777 = vmatprep.subr.bf16.mxu0 %v776_v3 }
   0x6   :  { %21 = vsyncpa [#allocation8], 0  ;;  %779 = vmatpush3.bf16.msra.mxu0 %v776_v3  ;;  %v44_v10 = vsel %vm43_vm0, %v42_v9, 0.0  ;;  %v784_v11 = vpack.c.bf16 %v58_v8, %v57_v7  ;;  %v59_v12 = vld [vmem:[%s1247_s2 + $0x30] sm:$0xff]  ;;  %v60_v13 = vld [vmem:[%s1247_s2 + $0x38] sm:$0xff]  ;;  %v143_v41 = vlaneseq  ;;  %vm336_vm3 = vcmask 130048  }
   0x7   :  { %781 = vmatprep.subr.bf16.mxu0 %v780_v6  ;;  %712 = vmatprep.mubr.msk.f32.mxu0 %vm61_vm1, %v44_v10  ;;  %v788_v14 = vpack.c.bf16 %v60_v13, %v59_v12  ;;  %v229_v17 = vld [vmem:[%s1249_s4] sm:$0xff]  ;;  %v230_v18 = vld [vmem:[%s1249_s4 + $0x8] sm:$0xff]  ;;  %v231_v19 = vld [vmem:[%s1249_s4 + $0x10] sm:$0xff]  ;;  %s955_s25 = smov [#allocation2]  }
   0x8   :  { %v792_v20 = vpack.c.bf16 %v230_v18, %v229_v17  ;;  %v232_v21 = vld [vmem:[%s1249_s4 + $0x18] sm:$0xff]  ;;  %v233_v23 = vld [vmem:[%s1249_s4 + $0x20] sm:$0xff]  ;;  %v234_v24 = vld [vmem:[%s1249_s4 + $0x28] sm:$0xff]  ;;  %v144_v42 = vshrl.u32 %v143_v41, 7  ;;  %s593_s26 = sshll.u32 %s955_s25, 4  ;;  %s594_s26 = int_to_ptr.vmem [resolvable:$true] %s593_s26 }
   0x9   :  { %v796_v22 = vpack.c.bf16 %v232_v21, %v231_v19  ;;  %v800_v25 = vpack.c.bf16 %v234_v24, %v233_v23  ;;  %v235_v26 = vld [vmem:[%s1249_s4 + $0x30] sm:$0xff]  ;;  %v236_v27 = vld [vmem:[%s1249_s4 + $0x38] sm:$0xff]  ;;  %v237_v29 = vld [vmem:[%s1249_s4 + $0x40] sm:$0xff] }
   0xa   :  { %783 = vmatpush3.bf16.msra.mxu0 %v780_v6  ;;  %793 = vmatprep.subr.bf16.mxu1 %v792_v20  ;;  %v804_v28 = vpack.c.bf16 %v236_v27, %v235_v26  ;;  %v238_v30 = vld [vmem:[%s1249_s4 + $0x48] sm:$0xff]  ;;  %v239_v32 = vld [vmem:[%s1249_s4 + $0x50] sm:$0xff]  ;;  %v240_v33 = vld [vmem:[%s1249_s4 + $0x58] sm:$0xff]  ;;  %v1110_v43 = vsub.s32 0, %v144_v42 }
   0xb   :  { %785 = vmatprep.subr.bf16.mxu0 %v784_v11  ;;  %795 = vmatpush3.bf16.msra.mxu1 %v792_v20  ;;  %v808_v31 = vpack.c.bf16 %v238_v30, %v237_v29  ;;  %v812_v34 = vpack.c.bf16 %v240_v33, %v239_v32  ;;  %v241_v35 = vld [vmem:[%s1249_s4 + $0x60] sm:$0xff]  ;;  %v242_v36 = vld [vmem:[%s1249_s4 + $0x68] sm:$0xff]  ;;  %v243_v38 = vld [vmem:[%s1249_s4 + $0x70] sm:$0xff]  ;;  %v1130_v32 = vsub.s32 1, %v144_v42  ;;  %v1132_v33 = vsub.s32 2, %v144_v42 }
   0xc   :  { %797 = vmatprep.subr.bf16.mxu1 %v796_v22  ;;  %v816_v37 = vpack.c.bf16 %v242_v36, %v241_v35  ;;  %v244_v39 = vld [vmem:[%s1249_s4 + $0x78] sm:$0xff]  ;;  %v1115_v44 = vld [vmem:[%s1248_s3 + $0x4] sm:$0x7]  ;;  %v1120_v45 = vld [vmem:[%s1248_s3] sm:$0x7]  ;;  %s953_s3 = smov 64  }
   0xd   :  { %v820_v40 = vpack.c.bf16 %v244_v39, %v243_v38  ;;  %v150_v46 = vrot.slane %v1115_v44, %v1110_v43  ;;  %v146_v47 = vrot.slane %v1120_v45, %v1110_v43  ;;  %v210_v35 = vrot.slane %v1115_v44, %v1130_v32  ;;  %vm645_vm2 = vmneg %vm61_vm1 }
   0xe   :  { %787 = vmatpush3.bf16.msra.mxu0 %v784_v11  ;;  %v206_v38 = vrot.slane %v1120_v45, %v1130_v32  ;;  %v220_v41 = vrot.slane %v1115_v44, %v1132_v33  ;;  %v340_v44 = vld [vmem:[%s1251_s6] sm:$0xff] }
   0xf   :  { %789 = vmatprep.subr.bf16.mxu0 %v788_v14  ;;  %799 = vmatpush3.bf16.msra.mxu1 %v796_v22 }
  0x10   :  { %801 = vmatprep.subr.bf16.mxu1 %v800_v25 }
  0x12   :  { %791 = vmatpush3.bf16.msra.mxu0 %v788_v14 }
  0x13   :  { %803 = vmatpush3.bf16.msra.mxu1 %v800_v25 }
  0x14   :  { %805 = vmatprep.subr.bf16.mxu1 %v804_v28 }
  0x17   :  { %807 = vmatpush3.bf16.msra.mxu1 %v804_v28 }
  0x18   :  { %809 = vmatprep.subr.bf16.mxu1 %v808_v31 }
  0x1b   :  { %811 = vmatpush3.bf16.msra.mxu1 %v808_v31 }
  0x1c   :  { %813 = vmatprep.subr.bf16.mxu1 %v812_v34 }
  0x1f   :  { %815 = vmatpush3.bf16.msra.mxu1 %v812_v34 }
  0x20   :  { %817 = vmatprep.subr.bf16.mxu1 %v816_v37 }
  0x23   :  { %819 = vmatpush3.bf16.msra.mxu1 %v816_v37 }
  0x24   :  { %821 = vmatprep.subr.bf16.mxu1 %v820_v40 }
  0x27   :  { %823 = vmatpush3.bf16.msra.mxu1 %v820_v40 }
  0x74   :  { %v48_v15 = vpop.permute.xlu0 %47 }
  0x75   :  { %v50_v16 = vsel %vm43_vm0, 0.0, %v48_v15 }
  0x76   :  { %713 = vmatmul.mubr.msk.f32.vlgmr.msra.gmra.mrb[0].mxu0 %vm61_vm1, %v50_v16 }
 0x149   :  { %v714_v48 = vpop.f32.mrb[0].mxu0 }
 0x14a   :  { %v152_v49 = vadd.f32 %v714_v48, %v150_v46  ;;  %v134_v50 = vpop.f32.mrb[1].mxu0 }
 0x14b   :  { %v151_v51 = vadd.f32 %v146_v47, %v134_v50  ;;  %v216_v47 = vrot.slane %v1120_v45, %v1132_v33  ;;  %v341_v45 = vld [vmem:[%s1251_s6 + $0x8] sm:$0xff] }
 0x14c   :  { %v154_v52 = vmax.f32 %v152_v49, 0.0 }
 0x14d   :  { %v153_v53 = vmax.f32 %v151_v51, 0.0 }
 0x14e   :  { %v162_v54 = vsel %vm61_vm1, %v154_v52, 0.0  ;;  %v172_v55 = vmul.f32 %v154_v52, %v154_v52 }
 0x14f   :  { %v163_v56 = vrot.slane %v162_v54, 4  ;;  %v155_v57 = vsel %vm61_vm1, %v153_v53, 0.0  ;;  %v171_v58 = vmul.f32 %v153_v53, %v153_v53 }
 0x150   :  { %v180_v59 = vsel %vm61_vm1, %v172_v55, 0.0  ;;  %v156_v60 = vrot.slane %v155_v57, 4 }
 0x151   :  { %v164_v61 = vadd.f32 %v163_v56, %v162_v54  ;;  %v181_v62 = vrot.slane %v180_v59, 4  ;;  %v173_v63 = vsel %vm61_vm1, %v171_v58, 0.0  ;;  %v647_v54 = vld [vmem:[%s1250_s5] ss:$0 sm:$0xff] }
 0x152   :  { %v157_v0 = vadd.f32 %v156_v60, %v155_v57  ;;  %v174_v1 = vrot.slane %v173_v63, 4  ;;  %v490_v60 = vld [vmem:[%s1253_s8 + $0x8] sm:$0xff] }
 0x153   :  { %v165_v2 = vrot.slane %v164_v61, 2  ;;  %v182_v3 = vadd.f32 %v181_v62, %v180_v59  ;;  %v489_v59 = vld [vmem:[%s1253_s8] sm:$0xff]  ;;  %v491_v62 = vld [vmem:[%s1253_s8 + $0x10] sm:$0xff] }
 0x154   :  { %v158_v4 = vrot.slane %v157_v0, 2  ;;  %v175_v5 = vadd.f32 %v174_v1, %v173_v63  ;;  %v492_v63 = vld [vmem:[%s1253_s8 + $0x18] sm:$0xff]  ;;  %v493_v1 = vld [vmem:[%s1253_s8 + $0x20] sm:$0xff] }
 0x155   :  { %v166_v6 = vadd.f32 %v165_v2, %v164_v61  ;;  %v183_v7 = vrot.slane %v182_v3, 2  ;;  %v828_v61 = vpack.c.bf16 %v490_v60, %v489_v59  ;;  %v494_v2 = vld [vmem:[%s1253_s8 + $0x28] sm:$0xff] }
 0x156   :  { %v159_v8 = vadd.f32 %v158_v4, %v157_v0  ;;  %v176_v9 = vrot.slane %v175_v5, 2  ;;  %v832_v0 = vpack.c.bf16 %v492_v63, %v491_v62  ;;  %v495_v4 = vld [vmem:[%s1253_s8 + $0x30] sm:$0xff] }
 0x157   :  { %v167_v10 = vrot.slane %v166_v6, 1  ;;  %v184_v11 = vadd.f32 %v183_v7, %v182_v3  ;;  %v836_v3 = vpack.c.bf16 %v494_v2, %v493_v1  ;;  %v339_v7 = vld [vmem:[%s1252_s7] sm:$0x7]  ;;  %s954_s7 = smov [#allocation4]  }
 0x158   :  { %v160_v12 = vrot.slane %v159_v8, 1  ;;  %v177_v13 = vadd.f32 %v176_v9, %v175_v5  ;;  %v496_v5 = vld [vmem:[%s1253_s8 + $0x38] sm:$0xff]  ;;  %v480_v60 = vrot.slane %v339_v7, %v1130_v32  ;;  %v486_v1 = vrot.slane %v339_v7, %v1132_v33  ;;  %s603_s8 = sshll.u32 %s954_s7, 4  ;;  %s604_s8 = int_to_ptr.vmem [resolvable:$true] %s603_s8 }
 0x159   :  { %v168_v14 = vadd.f32 %v167_v10, %v166_v6  ;;  %v185_v15 = vrot.slane %v184_v11, 1  ;;  %v840_v6 = vpack.c.bf16 %v496_v5, %v495_v4  ;;  %s858_s27 = scalar_lea.vmem %s604_s8, 128  ;;  %p863_p1 = scmp.lt.s32.totalorder %s604_s8, %s604_s8 }
 0x15a   :  { %v161_v16 = vadd.f32 %v160_v12, %v159_v8  ;;  %v178_v17 = vrot.slane %v177_v13, 1  ;;  %v345_v8 = vrot.slane %v339_v7, %v1110_v43  ;;  %p859_p0 = scmp.ne.s32.totalorder %s604_s8, %s858_s27  ;;  %p864_p2 = scmp.lt.s32.totalorder %s858_s27, %s858_s27 }
 0x15b   :  { %v170_v18 = vmul.f32 0.125, %v168_v14  ;;  %v186_v19 = vadd.f32 %v185_v15, %v184_v11 }
 0x15c   :  { %v169_v20 = vmul.f32 0.125, %v161_v16  ;;  %v179_v21 = vadd.f32 %v178_v17, %v177_v13  ;;  %p865_p3 = por %p864_p2, %p863_p1 }
 0x15d   :  { %v188_v22 = vmul.f32 0.125, %v186_v19  ;;  %v190_v23 = vmul.f32 %v170_v18, %v170_v18  ;;  %v196_v34 = vsub.f32 %v154_v52, %v170_v18  ;;  %v824_v52 = vpack.c.bf16 %v341_v45, %v340_v44 }
 0x15e   :  { %v187_v24 = vmul.f32 0.125, %v179_v21  ;;  %v189_v25 = vmul.f32 %v169_v20, %v169_v20  ;;  %v195_v37 = vsub.f32 %v153_v53, %v169_v20  ;;  %v648_v53 = vld [vmem:[%s1250_s5 + $0x1] ss:$0 sm:$0xff]  ;;  %p866_p4 = pnand %p865_p3, %p859_p0 }
 0x15f   :  { %v192_v26 = vsub.f32 %v188_v22, %v190_v23  ;;  %825 = vmatprep.subr.bf16.mxu0 %v824_v52 }
 0x160   :  { %v191_v27 = vsub.f32 %v187_v24, %v189_v25  ;;  %827 = vmatpush3.bf16.msra.mxu0 %v824_v52 }
 0x161   :  { %v194_v28 = vmax.f32 %v192_v26, 0.0  ;;  %829 = vmatprep.subr.bf16.mxu0 %v828_v61 }
 0x162   :  { %v193_v29 = vmax.f32 %v191_v27, 0.0 }
 0x163   :  { %v198_v30 = vadd.f32 1e-05, %v194_v28 }
 0x164   :  { %v197_v31 = vadd.f32 1e-05, %v193_v29 }
 0x165   :  { %850 = vrsqrt.f32 %v198_v30 }
 0x166   :  { %852 = vrsqrt.f32 %v197_v31 }
 0x16f   :  { %v851_v36 = vpop.eup %850 }
 0x170   :  { %v853_v39 = vpop.eup %852  ;;  %v202_v40 = vmul.f32 %v851_v36, %v196_v34 }
 0x171   :  { %v201_v46 = vmul.f32 %v853_v39, %v195_v37 }
 0x172   :  { %v212_v42 = vmul.f32 %v210_v35, %v202_v40 }
 0x173   :  { %v211_v48 = vmul.f32 %v206_v38, %v201_v46 }
 0x174   :  { %v222_v49 = vadd.f32 %v220_v41, %v212_v42 }
 0x175   :  { %v221_v50 = vadd.f32 %v216_v47, %v211_v48 }
 0x176   :  { %225 = vrot.lane.b32.xlu0 %v222_v49, %s953_s3 }
 0x177   :  { %747 = vmatprep.mubr.msk.f32.mxu1 %vm61_vm1, %v221_v50 }
 0x1e8   :  { %v226_v51 = vpop.permute.xlu0 %225 }
 0x1e9   :  { %748 = vmatmul.mubr.msk.f32.vlgmr.msra.gmra.mrb[0].mxu1 %vm645_vm2, %v226_v51 }
 0x2bc   :  { %v749_v55 = vpop.f32.mrb[0].mxu1 }
 0x2bd   :  { %v335_v56 = vadd.f32 %v749_v55, %v648_v53  ;;  %v311_v57 = vpop.f32.mrb[1].mxu1 }
 0x2be   :  { %v334_v58 = vadd.f32 %v647_v54, %v311_v57 }
 0x2bf   :  { %338 = vst.msk [vmem:[#allocation4] sm:$0xff] %vm336_vm3, %v335_v56 }
 0x2c0   :  { %754 = vmatprep.mubr.msk.f32.mxu0 %vm336_vm3, %v334_v58  ;;  %337 = vst.msk [vmem:[#allocation2] sm:$0xff] %vm336_vm3, %v334_v58 }
 0x2c1   :  { %755 = vmatmul.mubr.msk.f32.vlgmr.msra.gmra.mrb[2].mxu0 %vm336_vm3, %v335_v56 }
 0x2c2   :  { %831 = vmatpush3.bf16.msra.mxu0 %v828_v61 }
 0x2c3   :  { %833 = vmatprep.subr.bf16.mxu0 %v832_v0 }
 0x2c6   :  { %835 = vmatpush3.bf16.msra.mxu0 %v832_v0 }
 0x2c7   :  { %837 = vmatprep.subr.bf16.mxu0 %v836_v3 }
 0x2ca   :  { %839 = vmatpush3.bf16.msra.mxu0 %v836_v3 }
 0x2cb   :  { %841 = vmatprep.subr.bf16.mxu0 %v840_v6 }
 0x2ce   :  { %843 = vmatpush3.bf16.msra.mxu0 %v840_v6 }
 0x394   :  { %v756_v9 = vpop.f32.mrb[2].mxu0 }
 0x395   :  { %v424_v10 = vadd.f32 %v756_v9, %v345_v8  ;;  %v418_v11 = vpop.f32.mrb[3].mxu0 }
 0x396   :  { %v419_v12 = vadd.f32 %v418_v11, %v345_v8 }
 0x397   :  { %v428_v13 = vmax.f32 %v424_v10, 0.0 }
 0x398   :  { %v427_v14 = vmax.f32 %v419_v12, 0.0 }
 0x399   :  { %v436_v15 = vsel %vm61_vm1, %v428_v13, 0.0  ;;  %v446_v16 = vmul.f32 %v428_v13, %v428_v13 }
 0x39a   :  { %v437_v17 = vrot.slane %v436_v15, 4  ;;  %v429_v18 = vsel %vm61_vm1, %v427_v14, 0.0  ;;  %v445_v19 = vmul.f32 %v427_v14, %v427_v14 }
 0x39b   :  { %v454_v20 = vsel %vm61_vm1, %v446_v16, 0.0  ;;  %v430_v21 = vrot.slane %v429_v18, 4 }
 0x39c   :  { %v438_v22 = vadd.f32 %v437_v17, %v436_v15  ;;  %v455_v23 = vrot.slane %v454_v20, 4  ;;  %v447_v43 = vsel %vm61_vm1, %v445_v19, 0.0 }
 0x39d   :  { %v431_v24 = vadd.f32 %v430_v21, %v429_v18  ;;  %v448_v25 = vrot.slane %v447_v43, 4 }
 0x39e   :  { %v439_v26 = vrot.slane %v438_v22, 2  ;;  %v456_v27 = vadd.f32 %v455_v23, %v454_v20 }
 0x39f   :  { %v432_v28 = vrot.slane %v431_v24, 2  ;;  %v449_v29 = vadd.f32 %v448_v25, %v447_v43 }
 0x3a0   :  { %v440_v30 = vadd.f32 %v439_v26, %v438_v22  ;;  %v457_v31 = vrot.slane %v456_v27, 2 }
 0x3a1   :  { %v433_v34 = vadd.f32 %v432_v28, %v431_v24  ;;  %v450_v35 = vrot.slane %v449_v29, 2 }
 0x3a2   :  { %v441_v36 = vrot.slane %v440_v30, 1  ;;  %v458_v37 = vadd.f32 %v457_v31, %v456_v27 }
 0x3a3   :  { %v434_v38 = vrot.slane %v433_v34, 1  ;;  %v451_v39 = vadd.f32 %v450_v35, %v449_v29 }
 0x3a4   :  { %v442_v40 = vadd.f32 %v441_v36, %v440_v30  ;;  %v459_v41 = vrot.slane %v458_v37, 1 }
 0x3a5   :  { %v435_v46 = vadd.f32 %v434_v38, %v433_v34  ;;  %v452_v47 = vrot.slane %v451_v39, 1 }
 0x3a6   :  { %v444_v42 = vmul.f32 0.125, %v442_v40  ;;  %v460_v48 = vadd.f32 %v459_v41, %v458_v37 }
 0x3a7   :  { %v443_v49 = vmul.f32 0.125, %v435_v46  ;;  %v453_v50 = vadd.f32 %v452_v47, %v451_v39 }
 0x3a8   :  { %v462_v51 = vmul.f32 0.125, %v460_v48  ;;  %v464_v44 = vmul.f32 %v444_v42, %v444_v42  ;;  %v470_v59 = vsub.f32 %v428_v13, %v444_v42 }
 0x3a9   :  { %v461_v45 = vmul.f32 0.125, %v453_v50  ;;  %v463_v52 = vmul.f32 %v443_v49, %v443_v49  ;;  %v469_v62 = vsub.f32 %v427_v14, %v443_v49 }
 0x3aa   :  { %v466_v53 = vsub.f32 %v462_v51, %v464_v44 }
 0x3ab   :  { %v465_v54 = vsub.f32 %v461_v45, %v463_v52 }
 0x3ac   :  { %v468_v55 = vmax.f32 %v466_v53, 0.0 }
 0x3ad   :  { %v467_v56 = vmax.f32 %v465_v54, 0.0 }
 0x3ae   :  { %v472_v57 = vadd.f32 1e-05, %v468_v55 }
 0x3af   :  { %v471_v58 = vadd.f32 1e-05, %v467_v56 }
 0x3b0   :  { %854 = vrsqrt.f32 %v472_v57 }
 0x3b1   :  { %856 = vrsqrt.f32 %v471_v58 }
 0x3ba   :  { %v855_v61 = vpop.eup %854 }
 0x3bb   :  { %v857_v63 = vpop.eup %856  ;;  %v476_v0 = vmul.f32 %v855_v61, %v470_v59 }
 0x3bc   :  { %v475_v2 = vmul.f32 %v857_v63, %v469_v62 }
 0x3bd   :  { %v482_v3 = vmul.f32 %v480_v60, %v476_v0 }
 0x3be   :  { %v481_v4 = vmul.f32 %v480_v60, %v475_v2 }
 0x3bf   :  { %v488_v6 = vadd.f32 %v486_v1, %v482_v3 }
 0x3c0   :  { %v487_v5 = vadd.f32 %v486_v1, %v481_v4 }
 0x3c2   :  { %773 = vmatprep.mubr.msk.f32.mxu0 %vm61_vm1, %v487_v5 }
 0x3c3   :  { %774 = vmatmul.mubr.msk.f32.vlgmr.msra.gmra.mrb[4].mxu0 %vm61_vm1, %v488_v6 }
 0x3c4   :  { %869 = shalt.err (!%p866_p4)
}
 0x3c5   :  { %s870_s29 = scalar_lea.hbm %s1256_s11, 128 }
 0x3c6   :  { %p871_p5 = scmp.ne.s32.totalorder %s1256_s11, %s870_s29  ;;  %p874_p6 = scmp.lt.u32.totalorder %s870_s29, %s1256_s11 }
 0x3c8   :  { %p876_p7 = pnand %p874_p6, %p871_p5 }
 0x3ca   :  { %879 = shalt.err (!%p876_p7)
}
 0x3cb   :  { %606 = dma.vmem_to_hbm [thread:$0]  %s604_s8, 128, %s1256_s11, [#allocation5]  }
 0x3cc   :  { %s880_s16 = scalar_lea.vmem %s594_s26, 128  ;;  %p885_p9 = scmp.lt.s32.totalorder %s594_s26, %s594_s26 }
 0x3cd   :  { %p881_p8 = scmp.ne.s32.totalorder %s594_s26, %s880_s16  ;;  %p886_p10 = scmp.lt.s32.totalorder %s880_s16, %s880_s16 }
 0x3cf   :  { %p887_p11 = por %p886_p10, %p885_p9 }
 0x3d1   :  { %p888_p12 = pnand %p887_p11, %p881_p8 }
 0x3d3   :  { %891 = shalt.err (!%p888_p12)
}
 0x3d4   :  { %s892_s1 = scalar_lea.hbm %s1255_s10, 128 }
 0x3d5   :  { %p893_p13 = scmp.ne.s32.totalorder %s1255_s10, %s892_s1  ;;  %p896_p0 = scmp.lt.u32.totalorder %s892_s1, %s1255_s10 }
 0x3d7   :  { %p898_p1 = pnand %p896_p0, %p893_p13 }
 0x3d9   :  { %901 = shalt.err (!%p898_p1)
}
 0x3da   :  { %596 = dma.vmem_to_hbm [thread:$0]  %s594_s26, 128, %s1255_s10, [#allocation3]   ;;  %v651_v32 = vld [vmem:[%s1254_s9] ss:$0 sm:$0xff] }
 0x3db   :  { %s956_s24 = smov [#allocation7]   ;;  %s957_s8 = smov [#allocation6]  }
 0x3dc   :  { %s623_s7 = sshll.u32 %s956_s24, 4  ;;  %s613_s25 = sshll.u32 %s957_s8, 4  ;;  %s624_s7 = int_to_ptr.vmem [resolvable:$true] %s623_s7  ;;  %s614_s25 = int_to_ptr.vmem [resolvable:$true] %s613_s25 }
 0x3dd   :  { %s902_s27 = scalar_lea.vmem %s624_s7, 128  ;;  %p907_p3 = scmp.lt.s32.totalorder %s624_s7, %s624_s7 }
 0x3de   :  { %p903_p2 = scmp.ne.s32.totalorder %s624_s7, %s902_s27  ;;  %p908_p4 = scmp.lt.s32.totalorder %s902_s27, %s902_s27 }
 0x3e0   :  { %p909_p5 = por %p908_p4, %p907_p3 }
 0x3e2   :  { %p910_p6 = pnand %p909_p5, %p903_p2 }
 0x496   :  { %v775_v33 = vpop.f32.mrb[4].mxu0 }
 0x497   :  { %v582_v7 = vadd.f32 %v775_v33, %v651_v32  ;;  %v576_v8 = vpop.f32.mrb[5].mxu0 }
 0x498   :  { %v577_v9 = vadd.f32 %v651_v32, %v576_v8 }
 0x499   :  { %586 = vst.msk [vmem:[#allocation7] sm:$0xff] %vm43_vm0, %v582_v7 }
 0x49a   :  { %585 = vst.msk [vmem:[#allocation6] sm:$0xff] %vm43_vm0, %v577_v9 }
 0x49b   :  { %913 = shalt.err (!%p910_p6)
}
 0x49c   :  { %s914_s26 = scalar_lea.hbm %s1258_s13, 128 }
 0x49d   :  { %p915_p7 = scmp.ne.s32.totalorder %s1258_s13, %s914_s26  ;;  %p918_p8 = scmp.lt.u32.totalorder %s914_s26, %s1258_s13 }
 0x49f   :  { %p920_p9 = pnand %p918_p8, %p915_p7 }
 0x4a1   :  { %923 = shalt.err (!%p920_p9)
}
 0x4a2   :  { %626 = dma.vmem_to_hbm [thread:$0]  %s624_s7, 128, %s1258_s13, [#allocation8]  }
 0x4a3   :  { %s924_s14 = scalar_lea.vmem %s614_s25, 128  ;;  %p929_p11 = scmp.lt.s32.totalorder %s614_s25, %s614_s25 }
 0x4a4   :  { %p925_p10 = scmp.ne.s32.totalorder %s614_s25, %s924_s14  ;;  %p930_p12 = scmp.lt.s32.totalorder %s924_s14, %s924_s14 }
 0x4a6   :  { %p931_p13 = por %p930_p12, %p929_p11 }
 0x4a8   :  { %p932_p0 = pnand %p931_p13, %p925_p10 }
 0x4aa   :  { %935 = shalt.err (!%p932_p0)
}
 0x4ab   :  { %s936_s16 = scalar_lea.hbm %s1257_s12, 128 }
 0x4ac   :  { %p937_p1 = scmp.ne.s32.totalorder %s1257_s12, %s936_s16  ;;  %p940_p2 = scmp.lt.u32.totalorder %s936_s16, %s1257_s12 }
 0x4ae   :  { %p942_p3 = pnand %p940_p2, %p937_p1 }
 0x4b0   :  { %945 = shalt.err (!%p942_p3)
}
 0x4b1   :  { %616 = dma.vmem_to_hbm [thread:$0]  %s614_s25, 128, %s1257_s12, [#allocation5]  }
 0x4b2   :  { %946 = dma.done.wait [#allocation3], 128  }
 0x4b3   :  { %947 = vsyncadd [#allocation3], 4294967168 }
 0x4b4   :  { %948 = dma.done.wait [#allocation5], 256  }
 0x4b5   :  { %949 = vsyncadd [#allocation5], 4294967040 }
 0x4b6   :  { %950 = dma.done.wait [#allocation8], 128  }
 0x4b7   :  { %951 = vsyncadd [#allocation8], 4294967168 }
 0x4b8   :  { %639 = vsyncpa [#allocation3], 1 }
 0x4b9   :  { %640 = vsyncpa [#allocation5], 1 }
 0x4ba   :  { %641 = vsyncpa [#allocation8], 1 }

</bundles_post_ra>
